<compile_context>
chip_gen: v6e
topology: v6e:2x2x1
jax: 0.10.0
libtpu: 0.0.40
codegen_flags: <defaults>
</compile_context>

<pallas_src>
import functools

import jax
import jax.numpy as jnp
import numpy as np
from jax import lax
from jax.experimental import pallas as pl
from jax.experimental.pallas import tpu as pltpu


def _round_up(x, m):
    return (x + m - 1) // m * m


def _gine_kernel(eb_ref,                      # scalar prefetch: [grid_n] first edge-block per node tile
                 src_ref, dst_ref, ea_ref, x_ref, eps_ref,
                 w1_ref, b1_ref, w2_ref, b2_ref,
                 out_ref, acc_ref, *, gather_mode, use_bf16):
    i = pl.program_id(0)                      # node tile    ("parallel")
    k = pl.program_id(1)                      # edge block   ("arbitrary" reduction)
    tn, f_pad = acc_ref.shape
    te, nef = ea_ref.shape
    n_pad = x_ref.shape[0]
    mm_dtype = jnp.bfloat16 if use_bf16 else jnp.float32

    @pl.when(k == 0)
    def _init():
        acc_ref[...] = jnp.zeros_like(acc_ref)

    x_all = x_ref[...]                                            # [n_pad, f_pad]

    # ---- gather x[src] ------------------------------------------------------
    if gather_mode == "take":
        src_ids = src_ref[0, :]                                   # [te] int32 (lane-dense block)
        xj = jnp.take(x_all, src_ids, axis=0, mode="clip").astype(jnp.float32)
    else:  # "onehot" fallback: exact, O(te * n_pad) compare + MXU matmul
        col_ids = lax.broadcasted_iota(jnp.int32, (te, n_pad), 1)
        oh = (col_ids == src_ref[...]).astype(mm_dtype)           # src block is (te, 1)
        xj = jnp.dot(oh, x_all.astype(mm_dtype),
                     preferred_element_type=jnp.float32)

    # ---- GINE message (edge_attr arrives unpadded; zero-extend to f_pad) ----
    ea = ea_ref[...].astype(jnp.float32)                          # [te, nef]
    if nef < f_pad:
        ea = jnp.concatenate(
            [ea, jnp.zeros((te, f_pad - nef), jnp.float32)], axis=-1)
    msg = jnp.maximum(xj + ea, 0.0)                               # [te, f_pad]

    # ---- scatter-add into this node tile (tile-local one-hot on the MXU) ----
    row_ids = i * tn + lax.broadcasted_iota(jnp.int32, (tn, te), 0)
    oh_dst = (row_ids == dst_ref[...]).astype(mm_dtype)           # [tn, te]
    acc_ref[...] += jnp.dot(oh_dst, msg.astype(mm_dtype),
                            preferred_element_type=jnp.float32)

    # ---- combine + 2-layer MLP once per node tile ----------------------------
    @pl.when(k == pl.num_programs(1) - 1)
    def _finalize():
        eps = eps_ref[0, 0]
        row0 = pl.multiple_of(i * tn, tn)
        x_tile = x_ref[pl.ds(row0, tn), :].astype(jnp.float32)
        h = acc_ref[...] + (1.0 + eps) * x_tile
        h1 = jnp.maximum(
            jnp.dot(h.astype(mm_dtype), w1_ref[...].astype(mm_dtype),
                    preferred_element_type=jnp.float32) + b1_ref[...], 0.0)
        out = (jnp.dot(h1.astype(mm_dtype), w2_ref[...].astype(mm_dtype),
                       preferred_element_type=jnp.float32) + b2_ref[...])
        out_ref[...] = out.astype(out_ref.dtype)


def gine_conv(x, edge_index, edge_attr, params, *, tn=256, te=512, use_bf16=False):
    """GINEConv forward.

    x: [N, F] f32, edge_index: [2, E] int (row0 = src, row1 = dst), edge_attr: [E, F].
    params: w1 [F, H], b1 [H], w2 [H, nout], b2 [nout], eps scalar.
    """
    N, F = map(int, x.shape)
    E = int(edge_attr.shape[0])
    H = int(params["w1"].shape[1])
    nout = int(params["w2"].shape[1])
    dtype = x.dtype

    # ---- tile sizes / padded (lane-dense) layout -----------------------------
    f_pad = _round_up(max(F, H), 128)
    o_pad = _round_up(nout, 128)
    tn = max(8, min(tn, _round_up(N, 8)))
    # Keep >= 2 node tiles when possible so both v7x TensorCores get work.
    while tn > 8 and _round_up(N, tn) // tn < 2:
        tn = max(8, _round_up(tn // 2, 8))
    n_pad = _round_up(N, tn)
    grid_n = n_pad // tn
    te = max(128, min(te, _round_up(max(E, 1), 128)))
    e_pad = _round_up(max(E, 1), te)
    num_eblocks = e_pad // te

    # ---- host-side dst-bucketing (sort edges by destination) ----------------
    src = np.asarray(edge_index[0], dtype=np.int32)
    dst = np.asarray(edge_index[1], dtype=np.int32)
    order = np.argsort(dst, kind="stable")
    src_s, dst_s = src[order], dst[order]

    tile_lo = np.searchsorted(dst_s, np.arange(grid_n) * tn, side="left")
    tile_hi = np.searchsorted(dst_s, (np.arange(grid_n) + 1) * tn, side="left")
    eb_lo = tile_lo // te
    eb_hi = -(-tile_hi // te)                                     # ceil div
    max_eblocks = int(max(1, int((eb_hi - eb_lo).max()) if grid_n > 0 else 1))
    # Clamp so every tile's window of max_eblocks blocks stays in range; extra
    # blocks are harmless (their edges are masked by the dst compare).
    eb_start = np.minimum(eb_lo, num_eblocks - max_eblocks).astype(np.int32)

    src_row = np.zeros((1, e_pad), np.int32)
    src_row[0, :E] = src_s                                        # padded edges -> node 0
    src_col = src_row.reshape(e_pad, 1)
    dst_row = np.full((1, e_pad), n_pad, np.int32)                # sentinel: matches no row
    dst_row[0, :E] = dst_s

    def pad2(a, r, c):
        a = jnp.asarray(a, jnp.float32)
        return jnp.pad(a, ((0, r - a.shape[0]), (0, c - a.shape[1])))

    ea_s = jnp.asarray(edge_attr, jnp.float32)[jnp.asarray(order)]
    ea_p = jnp.pad(ea_s, ((0, e_pad - E), (0, 0)))                # stays unpadded in F
    x_p = pad2(x, n_pad, f_pad)
    w1 = pad2(params["w1"], f_pad, f_pad)
    b1 = pad2(jnp.reshape(params["b1"], (1, -1)), 1, f_pad)
    w2 = pad2(params["w2"], f_pad, o_pad)
    b2 = pad2(jnp.reshape(params["b2"], (1, -1)), 1, o_pad)
    eps = jnp.reshape(jnp.asarray(params["eps"], jnp.float32), (1, 1))
    eb_start_j = jnp.asarray(eb_start)
    src_row_j = jnp.asarray(src_row)
    src_col_j = jnp.asarray(src_col)
    dst_j = jnp.asarray(dst_row)

    steps = grid_n * max_eblocks
    bytes_accessed = 4 * (steps * (te * F + 2 * te)               # edge stream + ids
                          + n_pad * f_pad                          # x (read once)
                          + f_pad * (f_pad + o_pad) + f_pad + o_pad
                          + n_pad * o_pad + grid_n)

    try:
        vmem_cap = int(pltpu.get_tpu_info().vmem_capacity_bytes)
    except Exception:
        vmem_cap = 64 * 1024 * 1024                               # conservative (v7x)

    def run(gather_mode, single_buffer):
        resident_bufs = 1 if single_buffer else 2
        vmem_need = (2 * 4 * (te * F + 2 * te)                    # streamed blocks (dbl-buf)
                     + resident_bufs * 4 * (n_pad * f_pad + f_pad * f_pad
                                            + f_pad * o_pad + f_pad + o_pad)
                     + 2 * 4 * tn * o_pad                         # out block
                     + 4 * tn * f_pad                             # accumulator scratch
                     + 4 * te * (f_pad if gather_mode == "take" else n_pad))
        vmem_limit = int(min(max(vmem_need + (16 << 20), 32 << 20),
                             int(vmem_cap * 0.9)))

        gather_flops = (2 * te * n_pad * f_pad) if gather_mode == "onehot" else 0
        flops = (steps * (2 * tn * te * f_pad + gather_flops)
                 + grid_n * 2 * tn * f_pad * (f_pad + o_pad))

        def const_spec(shape):
            imap = lambda i, k, eb: (0, 0)
            if single_buffer:
                try:   # constant index_map -> no double buffer needed
                    return pl.BlockSpec(shape, imap, pipeline_mode=pl.Buffered(1))
                except Exception:
                    pass
            return pl.BlockSpec(shape, imap)

        if gather_mode == "take":
            src_arr = src_row_j
            src_spec = pl.BlockSpec((1, te), lambda i, k, eb: (0, eb[i] + k))
        else:
            src_arr = src_col_j
            src_spec = pl.BlockSpec((te, 1), lambda i, k, eb: (eb[i] + k, 0))

        kern = functools.partial(_gine_kernel, gather_mode=gather_mode,
                                 use_bf16=use_bf16)
        out_p = pl.pallas_call(
            kern,
            out_shape=jax.ShapeDtypeStruct((n_pad, o_pad), dtype),
            grid_spec=pltpu.PrefetchScalarGridSpec(
                num_scalar_prefetch=1,
                grid=(grid_n, max_eblocks),
                in_specs=[
                    src_spec,                                                # src ids
                    pl.BlockSpec((1, te), lambda i, k, eb: (0, eb[i] + k)),  # dst ids
                    pl.BlockSpec((te, F), lambda i, k, eb: (eb[i] + k, 0)),  # edge_attr
                    const_spec((n_pad, f_pad)),                              # x (resident)
                    pl.BlockSpec(memory_space=pltpu.MemorySpace.SMEM),       # eps scalar
                    const_spec((f_pad, f_pad)),                              # w1
                    const_spec((1, f_pad)),                                  # b1
                    const_spec((f_pad, o_pad)),                              # w2
                    const_spec((1, o_pad)),                                  # b2
                ],
                out_specs=pl.BlockSpec((tn, o_pad), lambda i, k, eb: (i, 0)),
                scratch_shapes=[pltpu.VMEM((tn, f_pad), jnp.float32)],
            ),
            compiler_params=pltpu.CompilerParams(
                dimension_semantics=("parallel", "arbitrary"),
                vmem_limit_bytes=vmem_limit,
            ),
            cost_estimate=pl.CostEstimate(
                flops=flops, transcendentals=0, bytes_accessed=bytes_accessed),
        )(eb_start_j, src_arr, dst_j, ea_p, x_p, eps, w1, b1, w2, b2)
        return jax.block_until_ready(out_p)

    # Preferred config first; fall back if the installed Pallas/Mosaic rejects the
    # jnp.take row gather or single-buffered (pipeline_mode) resident operands.
    out_p, last_err = None, None
    for cfg in (dict(gather_mode="take", single_buffer=True),
                dict(gather_mode="take", single_buffer=False),
                dict(gather_mode="onehot", single_buffer=False)):
        try:
            out_p = run(**cfg)
            break
        except Exception as err:   # noqa: BLE001 - deliberate capability fallback
            last_err = err
    if out_p is None:
        raise last_err

    return out_p[:N, :nout]


def reference(x, edge_index, edge_attr, params):
    src, dst = edge_index[0], edge_index[1]
    msg = jnp.maximum(x[src] + edge_attr, 0.0)
    agg = jnp.zeros_like(x).at[dst].add(msg)
    h = agg + (1.0 + params["eps"]) * x
    h1 = jnp.maximum(h @ params["w1"] + params["b1"], 0.0)
    return h1 @ params["w2"] + params["b2"]


def init_params(key, nin, nout):
    k1, k2, k3, k4 = jax.random.split(key, 4)
    bnd1 = 1.0 / np.sqrt(nin)
    w1 = jax.random.uniform(k1, (nin, nin), jnp.float32, -bnd1, bnd1)
    b1 = jax.random.uniform(k2, (nin,), jnp.float32, -bnd1, bnd1)
    w2 = jax.random.uniform(k3, (nin, nout), jnp.float32, -bnd1, bnd1)
    b2 = jax.random.uniform(k4, (nout,), jnp.float32, -bnd1, bnd1)
    eps = jnp.zeros((), jnp.float32)        # GINEConv(train_eps=True) init: eps = 0
    return {"w1": w1, "b1": b1, "w2": w2, "b2": b2, "eps": eps}


if __name__ == "__main__":
    key = jax.random.PRNGKey(0)
    N, E, NIN, NOUT = 48, 400, 32, 48

    kx, ke, ks, kd, kp = jax.random.split(key, 5)
    x = jax.random.normal(kx, (N, NIN), jnp.float32)
    edge_attr = jax.random.normal(ke, (E, NIN), jnp.float32)
    src = jax.random.randint(ks, (E,), 0, N, jnp.int32)
    dst = jax.random.randint(kd, (E,), 0, N, jnp.int32)
    edge_index = jnp.stack([src, dst], axis=0)          # [2, E]

    params = init_params(kp, NIN, NOUT)

    # Small tiles so the demo exercises several node tiles and per-tile edge-block
    # windows (grid_n = 3, multiple dst-bucketed edge blocks with clamping).
    out = gine_conv(x, edge_index, edge_attr, params, tn=16, te=128)
    out = jax.block_until_ready(out)

    ref = reference(x, edge_index, edge_attr, params)
    np.testing.assert_allclose(np.asarray(out), np.asarray(ref), rtol=1e-4, atol=1e-4)

    print("KERNEL_OK")
</pallas_src>

<mosaic_0001>
module attributes {stable_mosaic.version = 11 : i64} {
  func.func @_gine_kernel(%arg0: i32, %arg1: i32, %arg2: memref<3xi32, #tpu.memory_space<smem>>, %arg3: memref<128x1xi32, #tpu.memory_space<vmem>>, %arg4: memref<1x128xi32, #tpu.memory_space<vmem>>, %arg5: memref<128x32xf32, #tpu.memory_space<vmem>>, %arg6: memref<48x128xf32, #tpu.memory_space<vmem>>, %arg7: memref<1x1xf32, #tpu.memory_space<smem>>, %arg8: memref<128x128xf32, #tpu.memory_space<vmem>>, %arg9: memref<1x128xf32, #tpu.memory_space<vmem>>, %arg10: memref<128x128xf32, #tpu.memory_space<vmem>>, %arg11: memref<1x128xf32, #tpu.memory_space<vmem>>, %arg12: memref<16x128xf32, #tpu.memory_space<vmem>>, %arg13: memref<16x128xf32, #tpu.memory_space<vmem>>) attributes {dimension_semantics = [#tpu.dimension_semantics<parallel>, #tpu.dimension_semantics<arbitrary>], iteration_bounds = array<i64: 3, 2>, scalar_prefetch = 1 : i64, scratch_operands = 1 : i64, tpu.core_type = #tpu.core_type<tc>, window_params = [{transform_indices = @transform_0, window_bounds = array<i64: 128, 1>}, {transform_indices = @transform_1, window_bounds = array<i64: 1, 128>}, {transform_indices = @transform_2, window_bounds = array<i64: 128, 32>}, {pipeline_mode = #tpu.pipeline_mode<synchronous>, transform_indices = @transform_3, window_bounds = array<i64: 48, 128>}, {transform_indices = @transform_4, window_bounds = array<i64: 1, 1>}, {pipeline_mode = #tpu.pipeline_mode<synchronous>, transform_indices = @transform_5, window_bounds = array<i64: 128, 128>}, {pipeline_mode = #tpu.pipeline_mode<synchronous>, transform_indices = @transform_6, window_bounds = array<i64: 1, 128>}, {pipeline_mode = #tpu.pipeline_mode<synchronous>, transform_indices = @transform_7, window_bounds = array<i64: 128, 128>}, {pipeline_mode = #tpu.pipeline_mode<synchronous>, transform_indices = @transform_8, window_bounds = array<i64: 1, 128>}, {transform_indices = @transform_9, window_bounds = array<i64: 16, 128>}]} {
    %c0_i32 = arith.constant 0 : i32
    %0 = arith.cmpi eq, %arg1, %c0_i32 : i32
    %1 = arith.extui %0 : i1 to i32
    %c0_i32_0 = arith.constant 0 : i32
    %2 = arith.cmpi ne, %1, %c0_i32_0 : i32
    scf.if %2 {
      %cst_16 = arith.constant 0.000000e+00 : f32
      %33 = vector.broadcast %cst_16 : f32 to vector<16x128xf32>
      %c0_17 = arith.constant 0 : index
      %c0_18 = arith.constant 0 : index
      %34 = vector.load %arg13[%c0_17, %c0_18] : memref<16x128xf32, #tpu.memory_space<vmem>>, vector<16x128xf32>
      tpu.vector_store %arg13[%c0_17, %c0_18], %33 {strides = array<i32>} : memref<16x128xf32, #tpu.memory_space<vmem>>, vector<16x128xf32>,
    } else {
    }
    %c0 = arith.constant 0 : index
    %c0_1 = arith.constant 0 : index
    %3 = vector.load %arg6[%c0, %c0_1] : memref<48x128xf32, #tpu.memory_space<vmem>>, vector<48x128xf32>
    %4 = tpu.iota {dimensions = array<i32: 1>} : vector<128x48xi32>
    %c0_2 = arith.constant 0 : index
    %c0_3 = arith.constant 0 : index
    %5 = vector.load %arg3[%c0_2, %c0_3] : memref<128x1xi32, #tpu.memory_space<vmem>>, vector<128x1xi32>
    %6 = vector.broadcast %5 : vector<128x1xi32> to vector<128x48xi32>
    %7 = arith.cmpi eq, %4, %6 : vector<128x48xi32>
    %8 = arith.extui %7 : vector<128x48xi1> to vector<128x48xi32>
    %9 = arith.sitofp %8 : vector<128x48xi32> to vector<128x48xf32>
    %cst = arith.constant dense<0.000000e+00> : vector<128x128xf32>
    %10 = tpu.matmul %9, %3, %cst {dimension_numbers = #tpu.dot_dimension_numbers<[1], [0], [0], [1], [0, 0, 1, 1], [], []>} : vector<128x48xf32>, vector<48x128xf32>, vector<128x128xf32> -> vector<128x128xf32>
    %c0_4 = arith.constant 0 : index
    %c0_5 = arith.constant 0 : index
    %11 = vector.load %arg5[%c0_4, %c0_5] : memref<128x32xf32, #tpu.memory_space<vmem>>, vector<128x32xf32>
    %cst_6 = arith.constant 0.000000e+00 : f32
    %12 = vector.broadcast %cst_6 : f32 to vector<128x96xf32>
    %13 = tpu.concatenate %11, %12 in 1 : vector<128x32xf32>, vector<128x96xf32> -> vector<128x128xf32>
    %14 = arith.addf %10, %13 : vector<128x128xf32>
    %cst_7 = arith.constant 0.000000e+00 : f32
    %15 = vector.broadcast %cst_7 : f32 to vector<128x128xf32>
    %16 = arith.maximumf %14, %15 : vector<128x128xf32>
    %c16_i32 = arith.constant 16 : i32
    %17 = arith.muli %arg0, %c16_i32 : i32
    %18 = tpu.iota {dimensions = array<i32: 0>} : vector<16x128xi32>
    %19 = vector.broadcast %17 : i32 to vector<16x128xi32>
    %20 = arith.addi %19, %18 : vector<16x128xi32>
    %c0_8 = arith.constant 0 : index
    %c0_9 = arith.constant 0 : index
    %21 = vector.load %arg4[%c0_8, %c0_9] : memref<1x128xi32, #tpu.memory_space<vmem>>, vector<1x128xi32>
    %22 = vector.broadcast %21 : vector<1x128xi32> to vector<16x128xi32>
    %23 = arith.cmpi eq, %20, %22 : vector<16x128xi32>
    %24 = arith.extui %23 : vector<16x128xi1> to vector<16x128xi32>
    %25 = arith.sitofp %24 : vector<16x128xi32> to vector<16x128xf32>
    %c0_10 = arith.constant 0 : index
    %c0_11 = arith.constant 0 : index
    %26 = vector.load %arg13[%c0_10, %c0_11] : memref<16x128xf32, #tpu.memory_space<vmem>>, vector<16x128xf32>
    %cst_12 = arith.constant dense<0.000000e+00> : vector<16x128xf32>
    %27 = tpu.matmul %25, %16, %cst_12 {dimension_numbers = #tpu.dot_dimension_numbers<[1], [0], [0], [1], [0, 0, 1, 1], [], []>} : vector<16x128xf32>, vector<128x128xf32>, vector<16x128xf32> -> vector<16x128xf32>
    %28 = arith.addf %26, %27 : vector<16x128xf32>
    %c0_13 = arith.constant 0 : index
    %c0_14 = arith.constant 0 : index
    %29 = vector.load %arg13[%c0_13, %c0_14] : memref<16x128xf32, #tpu.memory_space<vmem>>, vector<16x128xf32>
    tpu.vector_store %arg13[%c0_13, %c0_14], %28 {strides = array<i32>} : memref<16x128xf32, #tpu.memory_space<vmem>>, vector<16x128xf32>,
    %c1_i32 = arith.constant 1 : i32
    %30 = arith.cmpi eq, %arg1, %c1_i32 : i32
    %31 = arith.extui %30 : i1 to i32
    %c0_i32_15 = arith.constant 0 : i32
    %32 = arith.cmpi ne, %31, %c0_i32_15 : i32
    scf.if %32 {
      %c0_16 = arith.constant 0 : index
      %c0_17 = arith.constant 0 : index
      %33 = memref.load %arg7[%c0_16, %c0_17] : memref<1x1xf32, #tpu.memory_space<smem>>
      %c16_i32_18 = arith.constant 16 : i32
      %34 = arith.muli %arg0, %c16_i32_18 : i32
      %35 = tpu.assume_multiple %34, 16 : i32
      %36 = arith.index_cast %35 : i32 to index
      %c0_19 = arith.constant 0 : index
      %37 = vector.load %arg6[%36, %c0_19] : memref<48x128xf32, #tpu.memory_space<vmem>>, vector<16x128xf32>
      %c0_20 = arith.constant 0 : index
      %c0_21 = arith.constant 0 : index
      %38 = vector.load %arg13[%c0_20, %c0_21] : memref<16x128xf32, #tpu.memory_space<vmem>>, vector<16x128xf32>
      %cst_22 = arith.constant 1.000000e+00 : f32
      %39 = arith.addf %cst_22, %33 : f32
      %40 = vector.broadcast %39 : f32 to vector<16x128xf32>
      %41 = arith.mulf %40, %37 : vector<16x128xf32>
      %42 = arith.addf %38, %41 : vector<16x128xf32>
      %c0_23 = arith.constant 0 : index
      %c0_24 = arith.constant 0 : index
      %43 = vector.load %arg8[%c0_23, %c0_24] : memref<128x128xf32, #tpu.memory_space<vmem>>, vector<128x128xf32>
      %cst_25 = arith.constant dense<0.000000e+00> : vector<16x128xf32>
      %44 = tpu.matmul %42, %43, %cst_25 {dimension_numbers = #tpu.dot_dimension_numbers<[1], [0], [0], [1], [0, 0, 1, 1], [], []>} : vector<16x128xf32>, vector<128x128xf32>, vector<16x128xf32> -> vector<16x128xf32>
      %c0_26 = arith.constant 0 : index
      %c0_27 = arith.constant 0 : index
      %45 = vector.load %arg9[%c0_26, %c0_27] : memref<1x128xf32, #tpu.memory_space<vmem>>, vector<1x128xf32>
      %46 = vector.broadcast %45 : vector<1x128xf32> to vector<16x128xf32>
      %47 = arith.addf %44, %46 : vector<16x128xf32>
      %cst_28 = arith.constant 0.000000e+00 : f32
      %48 = vector.broadcast %cst_28 : f32 to vector<16x128xf32>
      %49 = arith.maximumf %47, %48 : vector<16x128xf32>
      %c0_29 = arith.constant 0 : index
      %c0_30 = arith.constant 0 : index
      %50 = vector.load %arg10[%c0_29, %c0_30] : memref<128x128xf32, #tpu.memory_space<vmem>>, vector<128x128xf32>
      %cst_31 = arith.constant dense<0.000000e+00> : vector<16x128xf32>
      %51 = tpu.matmul %49, %50, %cst_31 {dimension_numbers = #tpu.dot_dimension_numbers<[1], [0], [0], [1], [0, 0, 1, 1], [], []>} : vector<16x128xf32>, vector<128x128xf32>, vector<16x128xf32> -> vector<16x128xf32>
      %c0_32 = arith.constant 0 : index
      %c0_33 = arith.constant 0 : index
      %52 = vector.load %arg11[%c0_32, %c0_33] : memref<1x128xf32, #tpu.memory_space<vmem>>, vector<1x128xf32>
      %53 = vector.broadcast %52 : vector<1x128xf32> to vector<16x128xf32>
      %54 = arith.addf %51, %53 : vector<16x128xf32>
      %c0_34 = arith.constant 0 : index
      %c0_35 = arith.constant 0 : index
      %55 = vector.load %arg12[%c0_34, %c0_35] : memref<16x128xf32, #tpu.memory_space<vmem>>, vector<16x128xf32>
      tpu.vector_store %arg12[%c0_34, %c0_35], %54 {strides = array<i32>} : memref<16x128xf32, #tpu.memory_space<vmem>>, vector<16x128xf32>,
    } else {
    }
    return
  }
  func.func @transform_0(%arg0: i32, %arg1: i32, %arg2: memref<3xi32, #tpu.memory_space<smem>>) -> (i32, i32) {
    %0 = arith.index_cast %arg0 : i32 to index
    %1 = memref.load %arg2[%0] : memref<3xi32, #tpu.memory_space<smem>>
    %2 = arith.addi %1, %arg1 : i32
    %c0_i32 = arith.constant 0 : i32
    %c0_i32_0 = arith.constant 0 : i32
    return %2, %c0_i32 : i32, i32
  }
  func.func @transform_1(%arg0: i32, %arg1: i32, %arg2: memref<3xi32, #tpu.memory_space<smem>>) -> (i32, i32) {
    %0 = arith.index_cast %arg0 : i32 to index
    %1 = memref.load %arg2[%0] : memref<3xi32, #tpu.memory_space<smem>>
    %2 = arith.addi %1, %arg1 : i32
    %c0_i32 = arith.constant 0 : i32
    %c0_i32_0 = arith.constant 0 : i32
    return %c0_i32, %2 : i32, i32
  }
  func.func @transform_2(%arg0: i32, %arg1: i32, %arg2: memref<3xi32, #tpu.memory_space<smem>>) -> (i32, i32) {
    %0 = arith.index_cast %arg0 : i32 to index
    %1 = memref.load %arg2[%0] : memref<3xi32, #tpu.memory_space<smem>>
    %2 = arith.addi %1, %arg1 : i32
    %c0_i32 = arith.constant 0 : i32
    %c0_i32_0 = arith.constant 0 : i32
    return %2, %c0_i32 : i32, i32
  }
  func.func @transform_3(%arg0: i32, %arg1: i32, %arg2: memref<3xi32, #tpu.memory_space<smem>>) -> (i32, i32) {
    %c0_i32 = arith.constant 0 : i32
    %c0_i32_0 = arith.constant 0 : i32
    %c0_i32_1 = arith.constant 0 : i32
    return %c0_i32, %c0_i32_0 : i32, i32
  }
  func.func @transform_4(%arg0: i32, %arg1: i32, %arg2: memref<3xi32, #tpu.memory_space<smem>>) -> (i32, i32) {
    %c0_i32 = arith.constant 0 : i32
    %c0_i32_0 = arith.constant 0 : i32
    %c0_i32_1 = arith.constant 0 : i32
    return %c0_i32, %c0_i32_0 : i32, i32
  }
  func.func @transform_5(%arg0: i32, %arg1: i32, %arg2: memref<3xi32, #tpu.memory_space<smem>>) -> (i32, i32) {
    %c0_i32 = arith.constant 0 : i32
    %c0_i32_0 = arith.constant 0 : i32
    %c0_i32_1 = arith.constant 0 : i32
    return %c0_i32, %c0_i32_0 : i32, i32
  }
  func.func @transform_6(%arg0: i32, %arg1: i32, %arg2: memref<3xi32, #tpu.memory_space<smem>>) -> (i32, i32) {
    %c0_i32 = arith.constant 0 : i32
    %c0_i32_0 = arith.constant 0 : i32
    %c0_i32_1 = arith.constant 0 : i32
    return %c0_i32, %c0_i32_0 : i32, i32
  }
  func.func @transform_7(%arg0: i32, %arg1: i32, %arg2: memref<3xi32, #tpu.memory_space<smem>>) -> (i32, i32) {
    %c0_i32 = arith.constant 0 : i32
    %c0_i32_0 = arith.constant 0 : i32
    %c0_i32_1 = arith.constant 0 : i32
    return %c0_i32, %c0_i32_0 : i32, i32
  }
  func.func @transform_8(%arg0: i32, %arg1: i32, %arg2: memref<3xi32, #tpu.memory_space<smem>>) -> (i32, i32) {
    %c0_i32 = arith.constant 0 : i32
    %c0_i32_0 = arith.constant 0 : i32
    %c0_i32_1 = arith.constant 0 : i32
    return %c0_i32, %c0_i32_0 : i32, i32
  }
  func.func @transform_9(%arg0: i32, %arg1: i32, %arg2: memref<3xi32, #tpu.memory_space<smem>>) -> (i32, i32) {
    %c0_i32 = arith.constant 0 : i32
    %c0_i32_0 = arith.constant 0 : i32
    return %arg0, %c0_i32 : i32, i32
  }
}

</mosaic_0001>

<bundles_post_ra>
// kernel: tpu_custom_call.1
= control target key start
LH: loop header
LB: loop body
LE: loop exit
PB: predicated region body
PF: predicated region fallthrough
CT: control target
= control target key end

     0   :  { %s2171_s0 = inlined_call_operand.vmem [shape: s32[3], index: 0, kind: input, shape index: {}]   ;;  %s2172_s1 = inlined_call_operand.vmem [shape: s32[512,1], index: 1, kind: input, shape index: {}]   ;;  %s2173_s2 = inlined_call_operand.vmem [shape: s32[1,512], index: 2, kind: input, shape index: {}]   ;;  %s2174_s3 = inlined_call_operand.vmem [shape: f32[512,32], index: 3, kind: input, shape index: {}]   ;;  %s2175_s4 = inlined_call_operand.vmem [shape: f32[48,128], index: 4, kind: input, shape index: {}]   ;;  %s2176_s5 = inlined_call_operand.<no memory space> [shape: f32[1,1], index: 5, kind: input, shape index: {}]   ;;  %s2177_s6 = inlined_call_operand.vmem [shape: f32[128,128], index: 6, kind: input, shape index: {}]   ;;  %s2178_s7 = inlined_call_operand.vmem [shape: f32[1,128], index: 7, kind: input, shape index: {}]   ;;  %s2179_s8 = inlined_call_operand.vmem [shape: f32[128,128], index: 8, kind: input, shape index: {}]   ;;  %s2180_s9 = inlined_call_operand.vmem [shape: f32[1,128], index: 9, kind: input, shape index: {}]   ;;  %s2181_s10 = inlined_call_operand.hbm [shape: f32[48,128], index: 10, kind: output, shape index: {}]  }
   0x1   :  { %s15_s15 = sshll.u32 %s2171_s0, 4  ;;  %19 = sst [smem:[#allocation5]] %s2176_s5  ;;  %s16_s15 = int_to_ptr.vmem [resolvable:$true] %s15_s15 }
   0x2   :  { %s1581_s18 = scalar_lea.vmem %s16_s15, 16  ;;  %p1586_p1 = scmp.lt.s32.totalorder %s16_s15, %s16_s15 }
   0x3   :  { %p1582_p0 = scmp.ne.s32.totalorder %s16_s15, %s1581_s18  ;;  %p1587_p2 = scmp.lt.s32.totalorder %s1581_s18, %s1581_s18 }
   0x5   :  { %p1588_p3 = por %p1587_p2, %p1586_p1 }
   0x7   :  { %p1589_p4 = pnand %p1588_p3, %p1582_p0 }
   0x9   :  { %1592 = shalt.err (!%p1589_p4)  }
   0xa   :  { %s1689_s19 = smov [#allocation4]  }
   0xb   :  { %18 = dma.vmem_to_smem %s16_s15, 16, %s1689_s19, [#allocation3] }
   0xc   :  { %1651 = dma.done.wait [#allocation3], 16 }
   0xd   :  { %1652 = vsyncadd [#allocation3], 4294967280 }
   0xe   :  { %21 = sfence }
   0xf   :  { %22 = vsyncpa [#allocation7], 0 }
  0x10   :  { %24 = vsyncpa [#allocation7 + $0x1], 0  ;;  %s1758_s0 = smov 0   ;;  %s1760_s20 = smov 0  }
  0x11   :  { %s1762_s5 = smov 0   ;;  %s1764_s21 = smov 0  }
  0x12   :  { %s1766_s22 = smov 0   ;;  %s1768_s23 = smov 0  }
  0x13   :  { %s1770_s24 = smov 0   ;;  %s1772_s25 = smov 0  }
  0x14 LB: > { %2189 = sst [smem:[#allocation10_spill]] %s1659_s0  ;;  %s1226_s26 = sadd.s32 4294967295, %s1687_s25   ;;  %s1687_s25 = sphi %s1772_s25, %s30_s25   ;;  %s1683_s24 = sphi %s1770_s24, %s2207_s24   ;;  %s1679_s23 = sphi %s1768_s23, %s2206_s23   ;;  %s1675_s22 = sphi %s1766_s22, %s2211_s22   ;;  %s1671_s21 = sphi %s1764_s21, %s2204_s21   ;;  %s1667_s5 = sphi %s1762_s5, %s2210_s5   ;;  %s1663_s20 = sphi %s1760_s20, %s2209_s20   ;;  %s1659_s0 = sphi %s1758_s0, %s2208_s0  }
  0x15   : > { %2190 = sst [smem:[#allocation11_spill]] %s1667_s5  ;;  %s1227_s27 = sadd.s32 4294967294, %s1687_s25  }
  0x16   : > { %2191 = sst [smem:[#allocation12_spill]] %s1679_s23  ;;  %s39_s28 = sadd.s32 1, %s1679_s23 }
  0x17   : > { %2192 = sst [smem:[#allocation13_spill]] %s1683_s24  ;;  %p40_p5 = scmp.ge.s32.totalorder %s39_s28, 2 }
  0x18   : > { %s42_s29 = sadd.s32 1, %s1683_s24  ;;  %p275_p6 = scmp.ne.s32.totalorder %s1667_s5, %s1663_s20 }
  0x19   : > { %p276_p7 = scmp.eq.s32.totalorder %s1226_s26, 5  ;;  %s2213_s28 = smov (%p40_p5, %s39_s28), 0 }
  0x1a   : > { %2193 = sst [smem:[#allocation14_spill]] %s2213_s28  ;;  %s2215_s29 = smov (!%p40_p5, %s42_s29), %s1683_s24 }
  0x1b   : > { %p1807_p8 = por %p276_p7, %p275_p6  ;;  %p281_p9 = scmp.ne.s32.totalorder %s1663_s20, %s1659_s0 }
  0x1c   : > { %p44_p10 = scmp.ge.s32.totalorder %s2215_s29, 3  ;;  %p282_p11 = scmp.eq.s32.totalorder %s1227_s27, 5 }
  0x1d   : > { %p1230_p12 = scmp.ge.s32.totalorder %s1687_s25, 1  ;;  %p354_p13 = scmp.lt.s32.totalorder %s1687_s25, 7 }
  0x1e   : > { %s2217_s29 = smov (%p44_p10, %s2215_s29), 0  ;;  %p1817_p0 = por %p282_p11, %p281_p9 }
  0x1f   : > { %2195 = sst [smem:[#allocation15_spill]] %s2217_s29  ;;  %p355_p1 = pnand %p1230_p12, %p354_p13 }
  0x20   : > { %s2196_s11 = scalar_select %p1817_p0, 1, 0 }
  0x21   : > { %s262_s12 = ssub.s32 %s1683_s24, %s2217_s29  ;;  %s265_s13 = sadd.s32 1, %s1667_s5 }
  0x22   : > { %2197 = sst [smem:[#allocation16_spill]] %s2196_s11  ;;  %p263_p2 = scmp.eq.s32.totalorder %s262_s12, 0 }
  0x23   : > { %358 = sbr.rel (%p355_p1) target bundleno = 1100 (0x44c), region = 56  ;;  %s2185_s15 = sand.u32 (!%p355_p1), 1, %s1663_s20  }
  0x24   : > { %s1825_s14 = scalar_select %p263_p2, %s1667_s5, %s265_s13  }
  0x25   : > { %s404_s16 = sld [smem:[#allocation4 + %s1675_s22]] (!%p355_p1)  ;;  %s1231_s17 = sshll.u32 (!%p355_p1), %s2185_s15, 4 }
  0x26   : > { %2198 = sst [smem:[#allocation17_spill]] %s1825_s14  ;;  %s1852_s0 = scalar_lea.vmem (!%p355_p1), [#allocation6], %s1231_s17 }
  0x27   : > { %s414_s18 = sld [smem:[#allocation4 + %s1675_s22]] (!%p355_p1)  ;;  %p1236_p6 = scmp.ne.s32.totalorder (!%p355_p1), %s1671_s21, 0 }
  0x28   : > { %s421_s19 = sld [smem:[#allocation4 + %s1675_s22]] }
  0x2b   : > { %s405_s26 = sadd.s32 %s1671_s21, %s404_s16 }
  0x2c   : > { %s1232_s27 = sshll.u32 %s405_s26, 4 }
  0x2d   : > { %s415_s12 = sadd.s32 %s1671_s21, %s414_s18  ;;  %p407_p3 = scmp.lt.s32.totalorder %s1232_s27, 63 }
  0x2e   : > { %p416_p4 = scmp.lt.s32.totalorder %s415_s12, 3  ;;  %s422_s13 = sadd.s32 %s1671_s21, %s421_s19 }
  0x2f   : > { %s2219_s27 = smov (!%p407_p3, %s1232_s27), 63  ;;  %s1234_s28 = sshll.u32 %s422_s13, 4 }
  0x30   : > { %s2221_s12 = smov (!%p416_p4, %s415_s12), 3  ;;  %s1233_s29 = sshll.u32 %s2219_s27, 3 }
  0x31   : > { %s1841_s14 = scalar_lea.vmem %s2172_s1, %s1233_s29  ;;  %s418_s16 = scalar_lea.vmem %s2173_s2, %s2221_s12 }
  0x32   : > { %p424_p5 = scmp.lt.s32.totalorder %s1234_s28, 63  ;;  %435 = sbr.rel (%p1236_p6) target bundleno = 57 (0x39), region = 60 }
  0x34   : > { %s2223_s28 = smov (!%p424_p5, %s1234_s28), 63 }
  0x35   : > { %s1235_s18 = sshll.u32 %s2223_s28, 3 }
  0x36   : > { %s1850_s11 = scalar_lea.vmem %s2174_s3, %s1235_s18 }
  0x37   : > { %v1690_v0 = vmov 0.0  }
  0x38   : > { %436 = vst [vmem:[#allocation2] sm:$0xff] %v1690_v0  ;;  %437 = vst [vmem:[#allocation2 + $0x8] sm:$0xff] %v1690_v0 }
  0x39 PF: > { %v448_v1 = vld [vmem:[%s1841_s14 + $0x10] sm:$0xff]  ;;  %v446_v2 = vld [vmem:[%s1841_s14] sm:$0xff]  ;;  %v1691_v3 = vmov 0   ;;  %v449_v4 = vld [vmem:[%s1841_s14 + $0x18] sm:$0xff]  ;;  %v444_v24 = vlaneseq  ;;  %vm591_vm0 = vcmask 392192   ;;  %v1692_v28 = vmov 0.0  }
  0x3a   : > { %1580 = vset.pattern.permute.xlu1 %v1691_v3  ;;  %1579 = vset.pattern.permute.xlu0 %v1691_v3  ;;  %v447_v5 = vld [vmem:[%s1841_s14 + $0x8] sm:$0xff]  ;;  %v442_v7 = vld [vmem:[%s2175_s4 + $0x20] sm:$0xff]  ;;  %v441_v10 = vld [vmem:[%s2175_s4 + $0x18] sm:$0xff]  ;;  %p1275_p7 = scmp.ne.s32.totalorder %s1671_s21, 1 }
  0x3b   : > { %469 = vperm.xlu1 %1580, %v448_v1   ;;  %463 = vperm.xlu0 %1579, %v446_v2   ;;  %v443_v6 = vld [vmem:[%s2175_s4 + $0x28] sm:$0xff]  ;;  %v450_v9 = vld [vmem:[%s1841_s14 + $0x20] sm:$0xff]  ;;  %v453_v11 = vld [vmem:[%s1841_s14 + $0x38] sm:$0xff]  ;;  %v1890_v25 = vand.u32 127, %v444_v24  ;;  %v803_v59 = vshrl.u32 %v444_v24, 7  ;;  %v1693_v1 = vmov 1.0  }
  0x3c   : > { %v451_v8 = vld [vmem:[%s1841_s14 + $0x28] sm:$0xff]  ;;  %1360 = vmatprep.subr.mxu0 %v443_v6  ;;  %v452_v12 = vld [vmem:[%s1841_s14 + $0x30] sm:$0xff]  ;;  %v454_v16 = vld [vmem:[%s1841_s14 + $0x40] sm:$0xff]  ;;  %s904_s28 = sld [smem:[#allocation5]] (!%p1275_p7) }
  0x3d   : > { %1361 = vmatpush3.msra.mxu0 %v443_v6  ;;  %v440_v13 = vld [vmem:[%s2175_s4 + $0x10] sm:$0xff]  ;;  %v439_v14 = vld [vmem:[%s2175_s4 + $0x8] sm:$0xff]  ;;  %v438_v17 = vld [vmem:[%s2175_s4] sm:$0xff]  ;;  %v804_v60 = vadd.s32 8, %v803_v59 }
  0x3e   : > { %1362 = vmatprep.subr.mxu0 %v442_v7  ;;  %v455_v15 = vld [vmem:[%s1841_s14 + $0x48] sm:$0xff]  ;;  %v457_v18 = vld [vmem:[%s1841_s14 + $0x58] sm:$0xff]  ;;  %v456_v19 = vld [vmem:[%s1841_s14 + $0x50] sm:$0xff] }
  0x3f   : > { %472 = vperm.xlu1 %1580, %v449_v4   ;;  %466 = vperm.xlu0 %1579, %v447_v5   ;;  %v459_v20 = vld [vmem:[%s1841_s14 + $0x68] sm:$0xff]  ;;  %v458_v21 = vld [vmem:[%s1841_s14 + $0x60] sm:$0xff]  ;;  %v461_v22 = vld [vmem:[%s1841_s14 + $0x78] sm:$0xff] }
  0x40   : > { %1363 = vmatpush3.msra.mxu0 %v442_v7  ;;  %v460_v23 = vld [vmem:[%s1841_s14 + $0x70] sm:$0xff]  ;;  %s1269_s14 = sshll.u32 %s1675_s22, 4  ;;  %v1935_v0 = vld [vmem:[%s418_s16] ss:$0 sm:$0xff]  ;;  %v569_v24 = vld [vmem:[%s1850_s11 + $0x58] sm:$0xff] }
  0x41   : > { %1364 = vmatprep.subr.mxu0 %v441_v10  ;;  %v805_v61 = vstv %s1269_s14  ;;  %s2010_s27 = scalar_lea.vmem (!%p1275_p7), %s2175_s4, %s1269_s14 }
  0x42   : > { %1365 = vmatpush3.msra.mxu0 %v441_v10  ;;  %v806_v62 = vadd.s32 %v805_v61, %v803_v59  ;;  %v1928_v63 = vadd.s32 %v805_v61, %v804_v60  ;;  %v560_v61 = vld [vmem:[%s1850_s11 + $0x10] sm:$0xff]  ;;  %s910_s5 = sadd.f32 (!%p1275_p7), 1.0, %s904_s28 }
  0x43   : > { %478 = vperm.xlu1 %1580, %v451_v8   ;;  %475 = vperm.xlu0 %1579, %v450_v9  }
  0x44   : > { %1366 = vmatprep.subr.mxu0 %v440_v13 }
  0x45   : > { %1367 = vmatpush3.msra.mxu0 %v440_v13 }
  0x46   : > { %1368 = vmatprep.subr.mxu0 %v439_v14 }
  0x47   : > { %484 = vperm.xlu1 %1580, %v453_v11   ;;  %481 = vperm.xlu0 %1579, %v452_v12  }
  0x48   : > { %1369 = vmatpush3.msra.mxu0 %v439_v14  ;;  %v573_v14 = vld [vmem:[%s1850_s11 + $0x78] sm:$0xff] }
  0x49   : > { %1370 = vmatprep.subr.mxu0 %v438_v17 }
  0x4a   : > { %1371 = vmatpush3.msra.mxu0 %v438_v17  ;;  %v572_v17 = vld [vmem:[%s1850_s11 + $0x70] sm:$0xff] }
  0x4b   : > { %490 = vperm.xlu1 %1580, %v455_v15   ;;  %487 = vperm.xlu0 %1579, %v454_v16   ;;  %v571_v16 = vld [vmem:[%s1850_s11 + $0x68] sm:$0xff] }
  0x4f   : > { %496 = vperm.xlu1 %1580, %v457_v18   ;;  %493 = vperm.xlu0 %1579, %v456_v19  }
  0x53   : > { %502 = vperm.xlu1 %1580, %v459_v20   ;;  %499 = vperm.xlu0 %1579, %v458_v21   ;;  %v570_v20 = vld [vmem:[%s1850_s11 + $0x60] sm:$0xff] }
  0x57   : > { %508 = vperm.xlu1 %1580, %v461_v22   ;;  %505 = vperm.xlu0 %1579, %v460_v23  }
  0xb6   : > { %v470_v26 = vpop.permute.xlu1 %469  ;;  %v464_v27 = vpop.permute.xlu0 %463 }
  0xb7   : > { %vm510_vm1 = vcmp.eq.s32.totalorder %v1890_v25, %v464_v27  ;;  %vm512_vm2 = vcmp.eq.s32.totalorder %v1890_v25, %v470_v26 }
  0xb8   : > { %v1237_v29 = vsel %vm510_vm1, 1.0, %v1692_v28  ;;  %v1239_v32 = vsel %vm512_vm2, 1.0, %v1692_v28  ;;  %vm813_vm2 = vcmp.eq.s32.totalorder %v806_v62, %v1935_v0 }
  0xb9   : > { %1372 = vmatprep.mubr.msk.f32.mxu0 %vm591_vm0, %v1237_v29  ;;  %1428 = vmatprep.mubr.msk.f32.mxu1 %vm813_vm2, %v1693_v1 }
  0xba   : > { %v473_v30 = vpop.permute.xlu1 %472  ;;  %v467_v31 = vpop.permute.xlu0 %466 }
  0xbb   : > { %vm511_vm3 = vcmp.eq.s32.totalorder %v1890_v25, %v467_v31  ;;  %vm513_vm4 = vcmp.eq.s32.totalorder %v1890_v25, %v473_v30 }
  0xbc   : > { %v1238_v33 = vsel %vm511_vm3, 1.0, %v1692_v28  ;;  %v1240_v36 = vsel %vm513_vm4, 1.0, %v1692_v28  ;;  %vm574_vm3 = vcmask 261120  }
  0xbd   : > { %1373 = vmatmul.mubr.msk.f32.vlgmr.msra.gmra.mxu0 %vm591_vm0, %v1238_v33  ;;  %v590_v19 = vsel %vm574_vm3, %v573_v14, 0.0  ;;  %v588_v21 = vsel %vm574_vm3, %v571_v16, 0.0  ;;  %v589_v23 = vsel %vm574_vm3, %v572_v17, 0.0  ;;  %v587_v26 = vsel %vm574_vm3, %v570_v20, 0.0  ;;  %v567_v33 = vld [vmem:[%s1850_s11 + $0x48] sm:$0xff]  ;;  %v558_v14 = vld [vmem:[%s1850_s11] sm:$0xff] }
  0xbe   : > { %v479_v34 = vpop.permute.xlu1 %478  ;;  %v476_v35 = vpop.permute.xlu0 %475  ;;  %1375 = vmatprep.mubr.msk.f32.mxu0 %vm591_vm0, %v1239_v32  ;;  %v586_v32 = vsel %vm574_vm3, %v569_v24, 0.0  ;;  %v819_v24 = vld [vmem:[#allocation2] sm:$0xff] }
  0xbf   : > { %vm514_vm5 = vcmp.eq.s32.totalorder %v1890_v25, %v476_v35  ;;  %vm515_vm6 = vcmp.eq.s32.totalorder %v1890_v25, %v479_v34 }
  0xc0   : > { %v1241_v37 = vsel %vm514_vm5, 1.0, %v1692_v28  ;;  %v1242_v40 = vsel %vm515_vm6, 1.0, %v1692_v28 }
  0xc1   : > { %1376 = vmatmul.mubr.msk.f32.gmra.mxu0 %vm591_vm0, %v1240_v36 }
  0xc2   : > { %v485_v38 = vpop.permute.xlu1 %484  ;;  %v482_v39 = vpop.permute.xlu0 %481  ;;  %1378 = vmatprep.mubr.msk.f32.mxu0 %vm591_vm0, %v1241_v37  ;;  %v566_v37 = vld [vmem:[%s1850_s11 + $0x40] sm:$0xff] }
  0xc3   : > { %vm516_vm7 = vcmp.eq.s32.totalorder %v1890_v25, %v482_v39  ;;  %vm517_vm8 = vcmp.eq.s32.totalorder %v1890_v25, %v485_v38 }
  0xc4   : > { %v1243_v41 = vsel %vm516_vm7, 1.0, %v1692_v28  ;;  %v1244_v44 = vsel %vm517_vm8, 1.0, %v1692_v28 }
  0xc5   : > { %1379 = vmatmul.mubr.msk.f32.gmra.mxu0 %vm591_vm0, %v1242_v40  ;;  %v584_v40 = vsel %vm574_vm3, %v567_v33, 0.0 }
  0xc6   : > { %v491_v42 = vpop.permute.xlu1 %490  ;;  %v488_v43 = vpop.permute.xlu0 %487  ;;  %1381 = vmatprep.mubr.msk.f32.mxu0 %vm591_vm0, %v1243_v41  ;;  %v565_v41 = vld [vmem:[%s1850_s11 + $0x38] sm:$0xff] }
  0xc7   : > { %vm518_vm9 = vcmp.eq.s32.totalorder %v1890_v25, %v488_v43  ;;  %vm519_vm10 = vcmp.eq.s32.totalorder %v1890_v25, %v491_v42 }
  0xc8   : > { %v1245_v45 = vsel %vm518_vm9, 1.0, %v1692_v28  ;;  %v1246_v48 = vsel %vm519_vm10, 1.0, %v1692_v28 }
  0xc9   : > { %1382 = vmatmul.mubr.msk.f32.gmra.mxu0 %vm591_vm0, %v1244_v44  ;;  %v583_v44 = vsel %vm574_vm3, %v566_v37, 0.0 }
  0xca   : > { %v497_v46 = vpop.permute.xlu1 %496  ;;  %v494_v47 = vpop.permute.xlu0 %493  ;;  %1384 = vmatprep.mubr.msk.f32.mxu0 %vm591_vm0, %v1245_v45  ;;  %v564_v45 = vld [vmem:[%s1850_s11 + $0x30] sm:$0xff] }
  0xcb   : > { %vm520_vm11 = vcmp.eq.s32.totalorder %v1890_v25, %v494_v47  ;;  %vm521_vm12 = vcmp.eq.s32.totalorder %v1890_v25, %v497_v46 }
  0xcc   : > { %v1247_v49 = vsel %vm520_vm11, 1.0, %v1692_v28  ;;  %v1248_v52 = vsel %vm521_vm12, 1.0, %v1692_v28 }
  0xcd   : > { %1385 = vmatmul.mubr.msk.f32.gmra.mxu0 %vm591_vm0, %v1246_v48  ;;  %v582_v48 = vsel %vm574_vm3, %v565_v41, 0.0 }
  0xce   : > { %v503_v50 = vpop.permute.xlu1 %502  ;;  %v500_v51 = vpop.permute.xlu0 %499  ;;  %1387 = vmatprep.mubr.msk.f32.mxu0 %vm591_vm0, %v1247_v49  ;;  %v563_v49 = vld [vmem:[%s1850_s11 + $0x28] sm:$0xff] }
  0xcf   : > { %vm522_vm13 = vcmp.eq.s32.totalorder %v1890_v25, %v500_v51  ;;  %vm523_vm14 = vcmp.eq.s32.totalorder %v1890_v25, %v503_v50 }
  0xd0   : > { %v1249_v53 = vsel %vm522_vm13, 1.0, %v1692_v28  ;;  %v1250_v56 = vsel %vm523_vm14, 1.0, %v1692_v28 }
  0xd1   : > { %1388 = vmatmul.mubr.msk.f32.gmra.mxu0 %vm591_vm0, %v1248_v52  ;;  %v581_v52 = vsel %vm574_vm3, %v564_v45, 0.0 }
  0xd2   : > { %v509_v54 = vpop.permute.xlu1 %508  ;;  %v506_v55 = vpop.permute.xlu0 %505  ;;  %1390 = vmatprep.mubr.msk.f32.mxu0 %vm591_vm0, %v1249_v53  ;;  %v562_v53 = vld [vmem:[%s1850_s11 + $0x20] sm:$0xff] }
  0xd3   : > { %vm524_vm15 = vcmp.eq.s32.totalorder %v1890_v25, %v506_v55  ;;  %vm525_vm1 = vcmp.eq.s32.totalorder %v1890_v25, %v509_v54  ;;  %v579_v60 = vsel %vm574_vm3, %v562_v53, 0.0 }
  0xd4   : > { %v1251_v57 = vsel %vm524_vm15, 1.0, %v1692_v28  ;;  %v1252_v58 = vsel %vm525_vm1, 1.0, %v1692_v28  ;;  %v568_v28 = vld [vmem:[%s1850_s11 + $0x50] sm:$0xff] }
  0xd5   : > { %1391 = vmatmul.mubr.msk.f32.gmra.mxu0 %vm591_vm0, %v1250_v56  ;;  %v585_v36 = vsel %vm574_vm3, %v568_v28, 0.0  ;;  %v580_v56 = vsel %vm574_vm3, %v563_v49, 0.0 }
  0xd6   : > { %1393 = vmatprep.mubr.msk.f32.mxu0 %vm591_vm0, %v1251_v57  ;;  %v561_v57 = vld [vmem:[%s1850_s11 + $0x18] sm:$0xff] }
  0xd9   : > { %1394 = vmatmul.mubr.msk.f32.gmra.mxu0 %vm591_vm0, %v1252_v58  ;;  %vm814_vm0 = vcmp.eq.s32.totalorder %v1928_v63, %v1935_v0 }
 0x17d   : > { %v1941_v2 = vpop.f32.mrf.mxu0 }
 0x17f   : > { %v1943_v3 = vpop.f32.mrf.mxu0 }
 0x181   : > { %v1945_v4 = vpop.f32.mrf.mxu0 }
 0x183   : > { %v1947_v5 = vpop.f32.mrf.mxu0 }
 0x185   : > { %v1949_v6 = vpop.f32.mrf.mxu0 }
 0x186   : > { %v732_v62 = vadd.f32 %v1949_v6, %v580_v56 }
 0x187   : > { %v1951_v7 = vpop.f32.mrf.mxu0 }
 0x188   : > { %v790_v16 = vmax.f32 %v732_v62, 0.0 }
 0x189   : > { %v1383_v8 = vpop.f32.mrf.mxu0 }
 0x18a   : > { %v742_v54 = vadd.f32 %v1383_v8, %v582_v48  ;;  %v578_v8 = vsel %vm574_vm3, %v561_v57, 0.0 }
 0x18b   : > { %v736_v9 = vpop.f32.mrf.mxu0 }
 0x18c   : > { %v737_v58 = vadd.f32 %v736_v9, %v581_v52  ;;  %v577_v9 = vsel %vm574_vm3, %v560_v61, 0.0 }
 0x18d   : > { %v1386_v10 = vpop.f32.mrf.mxu0  ;;  %v717_v17 = vadd.f32 %v1947_v5, %v577_v9 }
 0x18e   : > { %v752_v46 = vadd.f32 %v1386_v10, %v584_v40  ;;  %v792_v10 = vmax.f32 %v742_v54, 0.0 }
 0x18f   : > { %v746_v11 = vpop.f32.mrf.mxu0 }
 0x190   : > { %v747_v50 = vadd.f32 %v746_v11, %v583_v44  ;;  %v794_v55 = vmax.f32 %v752_v46, 0.0  ;;  %v559_v11 = vld [vmem:[%s1850_s11 + $0x8] sm:$0xff] }
 0x191   : > { %v1389_v12 = vpop.f32.mrf.mxu0  ;;  %v576_v6 = vsel %vm574_vm3, %v559_v11, 0.0 }
 0x192   : > { %v762_v38 = vadd.f32 %v1389_v12, %v586_v32  ;;  %v793_v59 = vmax.f32 %v747_v50, 0.0  ;;  %v727_v12 = vadd.f32 %v1951_v7, %v579_v60  ;;  %v712_v7 = vadd.f32 %v1941_v2, %v576_v6  ;;  %v820_v2 = vld [vmem:[#allocation2 + $0x8] sm:$0xff] }
 0x193   : > { %v756_v13 = vpop.f32.mrf.mxu0 }
 0x194   : > { %v757_v42 = vadd.f32 %v756_v13, %v585_v36  ;;  %v796_v47 = vmax.f32 %v762_v38, 0.0  ;;  %v791_v13 = vmax.f32 %v737_v58, 0.0 }
 0x195   : > { %v1392_v15 = vpop.f32.mrf.mxu0 }
 0x196   : > { %v772_v29 = vadd.f32 %v1392_v15, %v588_v21  ;;  %v795_v51 = vmax.f32 %v757_v42, 0.0  ;;  %v722_v15 = vadd.f32 %v1945_v4, %v578_v8  ;;  %v787_v4 = vmax.f32 %v717_v17, 0.0 }
 0x197   : > { %v766_v18 = vpop.f32.mrf.mxu0 }
 0x198   : > { %v767_v34 = vadd.f32 %v766_v18, %v587_v26  ;;  %v798_v39 = vmax.f32 %v772_v29, 0.0  ;;  %v789_v18 = vmax.f32 %v727_v12, 0.0  ;;  %v788_v20 = vmax.f32 %v722_v15, 0.0 }
 0x199   : > { %v1395_v22 = vpop.f32.mrf.mxu0 }
 0x19a   : > { %v782_v25 = vadd.f32 %v1395_v22, %v590_v19  ;;  %v797_v43 = vmax.f32 %v767_v34, 0.0  ;;  %v575_v19 = vsel %vm574_vm3, %v558_v14, 0.0  ;;  %v786_v22 = vmax.f32 %v712_v7, 0.0 }
 0x19b   : > { %v776_v27 = vpop.f32.mrf.mxu0  ;;  %v707_v21 = vadd.f32 %v1943_v3, %v575_v19 }
 0x19c   : > { %v800_v30 = vmax.f32 %v782_v25, 0.0  ;;  %v777_v31 = vadd.f32 %v776_v27, %v589_v23 }
 0x19d   : > { %v785_v23 = vmax.f32 %v707_v21, 0.0 }
 0x19e   : > { %v799_v35 = vmax.f32 %v777_v31, 0.0  ;;  %1396 = vmatprep.subr.mxu1 %v800_v30 }
 0x19f   : > { %1397 = vmatpush3.msra.mxu1 %v800_v30 }
 0x1a0   : > { %1398 = vmatprep.subr.mxu1 %v799_v35 }
 0x1a1   : > { %1399 = vmatpush3.msra.mxu1 %v799_v35 }
 0x1a2   : > { %1400 = vmatprep.subr.mxu1 %v798_v39 }
 0x1a3   : > { %1401 = vmatpush3.msra.mxu1 %v798_v39 }
 0x1a4   : > { %1402 = vmatprep.subr.mxu1 %v797_v43 }
 0x1a5   : > { %1403 = vmatpush3.msra.mxu1 %v797_v43 }
 0x1a6   : > { %1404 = vmatprep.subr.mxu1 %v796_v47 }
 0x1a7   : > { %1405 = vmatpush3.msra.mxu1 %v796_v47 }
 0x1a8   : > { %1406 = vmatprep.subr.mxu1 %v795_v51 }
 0x1a9   : > { %1407 = vmatpush3.msra.mxu1 %v795_v51 }
 0x1aa   : > { %1408 = vmatprep.subr.mxu1 %v794_v55 }
 0x1ab   : > { %1409 = vmatpush3.msra.mxu1 %v794_v55 }
 0x1ac   : > { %1410 = vmatprep.subr.mxu1 %v793_v59 }
 0x1ad   : > { %1411 = vmatpush3.msra.mxu1 %v793_v59 }
 0x1ae   : > { %1412 = vmatprep.subr.mxu1 %v792_v10 }
 0x1af   : > { %1413 = vmatpush3.msra.mxu1 %v792_v10 }
 0x1b0   : > { %1414 = vmatprep.subr.mxu1 %v791_v13 }
 0x1b1   : > { %1415 = vmatpush3.msra.mxu1 %v791_v13 }
 0x1b2   : > { %1416 = vmatprep.subr.mxu1 %v790_v16 }
 0x1b3   : > { %1417 = vmatpush3.msra.mxu1 %v790_v16 }
 0x1b4   : > { %1418 = vmatprep.subr.mxu1 %v789_v18 }
 0x1b5   : > { %1419 = vmatpush3.msra.mxu1 %v789_v18 }
 0x1b6   : > { %1420 = vmatprep.subr.mxu1 %v788_v20 }
 0x1b7   : > { %1421 = vmatpush3.msra.mxu1 %v788_v20 }
 0x1b8   : > { %1422 = vmatprep.subr.mxu1 %v787_v4 }
 0x1b9   : > { %1423 = vmatpush3.msra.mxu1 %v787_v4 }
 0x1ba   : > { %1424 = vmatprep.subr.mxu1 %v786_v22 }
 0x1bb   : > { %1425 = vmatpush3.msra.mxu1 %v786_v22 }
 0x1bc   : > { %1426 = vmatprep.subr.mxu1 %v785_v23 }
 0x1bd   : > { %1427 = vmatpush3.msra.mxu1 %v785_v23 }
 0x1be   : > { %1429 = vmatmul.mubr.msk.f32.vlgmr.msra.gmra.mxu1 %vm814_vm0, %v1693_v1 }
 0x27e   : > { %v1430_v5 = vpop.f32.mrf.mxu1 }
 0x27f   : > { %v897_v3 = vadd.f32 %v1430_v5, %v820_v2  ;;  %903 = sbr.rel (%p1275_p7) target bundleno = 1075 (0x433), region = 64 }
 0x280   : > { %v887_v25 = vpop.f32.mrf.mxu1 }
 0x281   : > { %899 = vst [vmem:[#allocation2 + $0x8] sm:$0xff] %v897_v3  ;;  %v896_v26 = vadd.f32 %v887_v25, %v819_v24 }
 0x283   : > { %898 = vst [vmem:[#allocation2] sm:$0xff] %v896_v26 }
 0x284   : > { %v931_v27 = vld [vmem:[%s2177_s6 + $0x78] sm:$0xff]  ;;  %v930_v63 = vld [vmem:[%s2177_s6 + $0x70] sm:$0xff]  ;;  %v929_v0 = vld [vmem:[%s2177_s6 + $0x68] sm:$0xff]  ;;  %v911_v34 = vstv %s910_s5 }
 0x285   : > { %1431 = vmatprep.subr.mxu0 %v931_v27  ;;  %v928_v1 = vld [vmem:[%s2177_s6 + $0x60] sm:$0xff]  ;;  %v927_v28 = vld [vmem:[%s2177_s6 + $0x58] sm:$0xff]  ;;  %v1030_v31 = vld [vmem:[%s2179_s8 + $0x70] sm:$0xff] }
 0x286   : > { %1432 = vmatpush3.msra.mxu0 %v931_v27  ;;  %v906_v29 = vld [vmem:[%s2010_s27] sm:$0xff]  ;;  %v1031_v30 = vld [vmem:[%s2179_s8 + $0x78] sm:$0xff]  ;;  %v926_v32 = vld [vmem:[%s2177_s6 + $0x50] sm:$0xff] }
 0x287   : > { %1433 = vmatprep.subr.mxu0 %v930_v63  ;;  %1466 = vmatprep.subr.mxu1 %v1031_v30  ;;  %v1029_v35 = vld [vmem:[%s2179_s8 + $0x68] sm:$0xff]  ;;  %v912_v36 = vmul.f32 %v911_v34, %v906_v29  ;;  %v1028_v39 = vld [vmem:[%s2179_s8 + $0x60] sm:$0xff]  ;;  %v1027_v41 = vld [vmem:[%s2179_s8 + $0x58] sm:$0xff] }
 0x288   : > { %1434 = vmatpush3.msra.mxu0 %v930_v63  ;;  %1467 = vmatpush3.msra.mxu1 %v1031_v30  ;;  %v925_v37 = vld [vmem:[%s2177_s6 + $0x48] sm:$0xff]  ;;  %v924_v40 = vld [vmem:[%s2177_s6 + $0x40] sm:$0xff]  ;;  %v923_v42 = vld [vmem:[%s2177_s6 + $0x38] sm:$0xff] }
 0x289   : > { %1435 = vmatprep.subr.mxu0 %v929_v0  ;;  %1468 = vmatprep.subr.mxu1 %v1030_v31  ;;  %v1026_v43 = vld [vmem:[%s2179_s8 + $0x50] sm:$0xff]  ;;  %v1025_v45 = vld [vmem:[%s2179_s8 + $0x48] sm:$0xff]  ;;  %v1024_v47 = vld [vmem:[%s2179_s8 + $0x40] sm:$0xff] }
 0x28a   : > { %1436 = vmatpush3.msra.mxu0 %v929_v0  ;;  %v908_v33 = vld [vmem:[#allocation2] sm:$0xff]  ;;  %1469 = vmatpush3.msra.mxu1 %v1030_v31  ;;  %v922_v44 = vld [vmem:[%s2177_s6 + $0x30] sm:$0xff]  ;;  %v921_v46 = vld [vmem:[%s2177_s6 + $0x28] sm:$0xff] }
 0x28b   : > { %1437 = vmatprep.subr.mxu0 %v928_v1  ;;  %v914_v38 = vadd.f32 %v912_v36, %v908_v33  ;;  %1470 = vmatprep.subr.mxu1 %v1029_v35  ;;  %v920_v48 = vld [vmem:[%s2177_s6 + $0x20] sm:$0xff]  ;;  %v1023_v49 = vld [vmem:[%s2179_s8 + $0x38] sm:$0xff]  ;;  %v907_v51 = vld [vmem:[%s2010_s27 + $0x8] sm:$0xff] }
 0x28c   : > { %1438 = vmatpush3.msra.mxu0 %v928_v1  ;;  %1471 = vmatpush3.msra.mxu1 %v1029_v35  ;;  %v919_v50 = vld [vmem:[%s2177_s6 + $0x18] sm:$0xff]  ;;  %v1022_v52 = vld [vmem:[%s2179_s8 + $0x30] sm:$0xff]  ;;  %v913_v54 = vmul.f32 %v911_v34, %v907_v51  ;;  %v1021_v55 = vld [vmem:[%s2179_s8 + $0x28] sm:$0xff] }
 0x28d   : > { %1439 = vmatprep.subr.mxu0 %v927_v28  ;;  %1463 = vmatprep.mubr.f32.mxu0 %v914_v38  ;;  %v918_v53 = vld [vmem:[%s2177_s6 + $0x10] sm:$0xff]  ;;  %v917_v56 = vld [vmem:[%s2177_s6 + $0x8] sm:$0xff]  ;;  %v1020_v58 = vld [vmem:[%s2179_s8 + $0x20] sm:$0xff] }
 0x28e   : > { %1440 = vmatpush3.msra.mxu0 %v927_v28  ;;  %1472 = vmatprep.subr.mxu1 %v1028_v39  ;;  %v909_v57 = vld [vmem:[#allocation2 + $0x8] sm:$0xff]  ;;  %v916_v59 = vld [vmem:[%s2177_s6] sm:$0xff]  ;;  %v1019_v61 = vld [vmem:[%s2179_s8 + $0x18] sm:$0xff] }
 0x28f   : > { %1441 = vmatprep.subr.mxu0 %v926_v32  ;;  %1473 = vmatpush3.msra.mxu1 %v1028_v39  ;;  %v915_v60 = vadd.f32 %v913_v54, %v909_v57  ;;  %v1018_v62 = vld [vmem:[%s2179_s8 + $0x10] sm:$0xff]  ;;  %v1017_v10 = vld [vmem:[%s2179_s8 + $0x8] sm:$0xff]  ;;  %v1016_v8 = vld [vmem:[%s2179_s8] sm:$0xff] }
 0x290   : > { %1442 = vmatpush3.msra.mxu0 %v926_v32  ;;  %1474 = vmatprep.subr.mxu1 %v1027_v41  ;;  %v1276_v11 = vld [vmem:[%s2178_s7] ss:$0 sm:$0xff] }
 0x291   : > { %1443 = vmatprep.subr.mxu0 %v925_v37  ;;  %1475 = vmatpush3.msra.mxu1 %v1027_v41  ;;  %v1277_v6 = vld [vmem:[%s2180_s9] ss:$0 sm:$0xff] }
 0x292   : > { %1444 = vmatpush3.msra.mxu0 %v925_v37  ;;  %1476 = vmatprep.subr.mxu1 %v1026_v43 }
 0x293   : > { %1445 = vmatprep.subr.mxu0 %v924_v40  ;;  %1477 = vmatpush3.msra.mxu1 %v1026_v43 }
 0x294   : > { %1446 = vmatpush3.msra.mxu0 %v924_v40  ;;  %1478 = vmatprep.subr.mxu1 %v1025_v45 }
 0x295   : > { %1447 = vmatprep.subr.mxu0 %v923_v42  ;;  %1479 = vmatpush3.msra.mxu1 %v1025_v45 }
 0x296   : > { %1448 = vmatpush3.msra.mxu0 %v923_v42  ;;  %1480 = vmatprep.subr.mxu1 %v1024_v47 }
 0x297   : > { %1449 = vmatprep.subr.mxu0 %v922_v44  ;;  %1481 = vmatpush3.msra.mxu1 %v1024_v47 }
 0x298   : > { %1450 = vmatpush3.msra.mxu0 %v922_v44  ;;  %1482 = vmatprep.subr.mxu1 %v1023_v49 }
 0x299   : > { %1451 = vmatprep.subr.mxu0 %v921_v46  ;;  %1483 = vmatpush3.msra.mxu1 %v1023_v49 }
 0x29a   : > { %1452 = vmatpush3.msra.mxu0 %v921_v46  ;;  %1484 = vmatprep.subr.mxu1 %v1022_v52 }
 0x29b   : > { %1453 = vmatprep.subr.mxu0 %v920_v48  ;;  %1485 = vmatpush3.msra.mxu1 %v1022_v52 }
 0x29c   : > { %1454 = vmatpush3.msra.mxu0 %v920_v48  ;;  %1486 = vmatprep.subr.mxu1 %v1021_v55 }
 0x29d   : > { %1455 = vmatprep.subr.mxu0 %v919_v50  ;;  %1487 = vmatpush3.msra.mxu1 %v1021_v55 }
 0x29e   : > { %1456 = vmatpush3.msra.mxu0 %v919_v50  ;;  %1488 = vmatprep.subr.mxu1 %v1020_v58 }
 0x29f   : > { %1457 = vmatprep.subr.mxu0 %v918_v53  ;;  %1489 = vmatpush3.msra.mxu1 %v1020_v58 }
 0x2a0   : > { %1458 = vmatpush3.msra.mxu0 %v918_v53  ;;  %1490 = vmatprep.subr.mxu1 %v1019_v61 }
 0x2a1   : > { %1459 = vmatprep.subr.mxu0 %v917_v56  ;;  %1491 = vmatpush3.msra.mxu1 %v1019_v61 }
 0x2a2   : > { %1460 = vmatpush3.msra.mxu0 %v917_v56  ;;  %1492 = vmatprep.subr.mxu1 %v1018_v62 }
 0x2a3   : > { %1461 = vmatprep.subr.mxu0 %v916_v59  ;;  %1493 = vmatpush3.msra.mxu1 %v1018_v62 }
 0x2a4   : > { %1462 = vmatpush3.msra.mxu0 %v916_v59  ;;  %1494 = vmatprep.subr.mxu1 %v1017_v10 }
 0x2a5   : > { %1464 = vmatmul.mubr.f32.vlgmr.msra.gmra.mxu0 %v915_v60  ;;  %1495 = vmatpush3.msra.mxu1 %v1017_v10 }
 0x2a6   : > { %1496 = vmatprep.subr.mxu1 %v1016_v8 }
 0x2a7   : > { %1497 = vmatpush3.msra.mxu1 %v1016_v8 }
 0x365   : > { %v1465_v12 = vpop.f32.mrf.mxu0 }
 0x366   : > { %v1011_v13 = vadd.f32 %v1465_v12, %v1276_v11 }
 0x367   : > { %v1005_v9 = vpop.f32.mrf.mxu0 }
 0x368   : > { %v1006_v14 = vadd.f32 %v1276_v11, %v1005_v9  ;;  %v1015_v16 = vmax.f32 %v1011_v13, 0.0 }
 0x36a   : > { %v1014_v15 = vmax.f32 %v1006_v14, 0.0 }
 0x36c   : > { %1498 = vmatprep.mubr.f32.mxu1 %v1014_v15 }
 0x36d   : > { %1499 = vmatmul.mubr.f32.vlgmr.msra.gmra.mxu1 %v1015_v16 }
 0x42d   : > { %v1500_v17 = vpop.f32.mrf.mxu1 }
 0x42e   : > { %v1111_v18 = vadd.f32 %v1500_v17, %v1277_v6 }
 0x42f   : > { %v1105_v19 = vpop.f32.mrf.mxu1 }
 0x430   : > { %1115 = vst [vmem:[%s1852_s0 + $0x8] sm:$0xff] %v1111_v18  ;;  %v1106_v7 = vadd.f32 %v1277_v6, %v1105_v19 }
 0x432   : > { %1114 = vst [vmem:[%s1852_s0] sm:$0xff] %v1106_v7 }
 0x433 PF: > { %s1283_s15 = sshll.u32 %s1675_s22, 8  ;;  %s1130_s18 = sshll.u32 %s1852_s0, 4  ;;  %s2116_s18 = int_to_ptr.vmem [resolvable:$true] %s1130_s18 }
 0x434   : > { %s2113_s13 = scalar_lea.hbm %s2181_s10, %s1283_s15  ;;  %s2199_s26 = sand.u32 1, %s1663_s20  }
 0x435   : > { %s2120_s19 = scalar_lea.sflag [#allocation7], %s2199_s26  ;;  %s1593_s5 = scalar_lea.vmem %s2116_s18, 256 }
 0x436   : > { %p1594_p9 = scmp.ne.s32.totalorder %s2116_s18, %s1593_s5  ;;  %s1694_s22 = smov [#allocation6]  }
 0x437   : > { %s1597_s23 = sshll.u32 %s1694_s22, 4  ;;  %s1598_s23 = int_to_ptr.vmem [resolvable:$false] %s1597_s23 }
 0x438   : > { %p1595_p10 = pnand %p1594_p9, %p1807_p8  ;;  %s1599_s11 = scalar_lea.vmem %s1598_s23, 512 }
 0x439   : > { %p1600_p12 = scmp.lt.s32.totalorder %s2116_s18, %s1598_s23  ;;  %p1601_p13 = scmp.lt.s32.totalorder %s1599_s11, %s1593_s5 }
 0x43a   : > { %p1596_p11 = pneg %p1595_p10 }
 0x43b   : > { %p1602_p1 = por %p1601_p13, %p1600_p12 }
 0x43d   : > { %p1603_p2 = pnand %p1602_p1, %p1596_p11 }
 0x43f   : > { %1606 = shalt.err (!%p1603_p2)
}
 0x440   : > { %s1607_s0 = scalar_lea.hbm %s2113_s13, 256  ;;  %s1611_s16 = scalar_lea.hbm %s2181_s10, 768 }
 0x441   : > { %p1608_p3 = scmp.ne.s32.totalorder %s2113_s13, %s1607_s0  ;;  %p1612_p6 = scmp.lt.s32.totalorder %s2113_s13, %s2181_s10 }
 0x442   : > { %p1613_p7 = scmp.lt.s32.totalorder %s1611_s16, %s1607_s0 }
 0x443   : > { %p1609_p4 = pnand %p1608_p3, %p1807_p8 }
 0x444   : > { %p1614_p9 = por %p1613_p7, %p1612_p6 }
 0x445   : > { %p1610_p5 = pneg %p1609_p4 }
 0x447   : > { %p1615_p10 = pnand %p1614_p9, %p1610_p5 }
 0x449   : > { %1618 = shalt.err (!%p1615_p10)
}
 0x44a   : > { %s1695_s28 = smov 128   ;;  %s1696_s27 = smov 8  }
 0x44b   : > { %1501 = dma.vmem_to_hbm [thread:$0]  (%p1807_p8), %s2116_s18, 256, %s2113_s13, %s2120_s19, %s1695_s28, %s1695_s28, %s1696_s27  }
 0x44c PF: > { %s2200_s15 = sld [smem:[#allocation10_spill]]  ;;  %p1507_p11 = scmp.ge.s32.totalorder %s1687_s25, 2 }
 0x44e   : > { %p1504_p12 = pnand %p1507_p11, %p1817_p0 }
 0x450   : > { %p1505_p13 = pneg %p1504_p12 }
 0x452   : > { %s1145_s17 = sand.u32 1, %s2200_s15  }
 0x453   : > { %s1146_s26 = scalar_lea.sflag [#allocation7], %s1145_s17 }
 0x454   : > { %1654 = dma.done.wait (%p1505_p13), %s1146_s26, 256  }
 0x455   : > { %1656 = vsyncadd (%p1505_p13), %s1146_s26, 4294967040  ;;  %s30_s25 = sadd.s32 1, %s1687_s25   ;;  %s2202_s5 = sld [smem:[#allocation11_spill]] }
 0x456   : > { %p27_p1 = scmp.ge.s32.totalorder %s30_s25, 8   ;;  %s2203_s22 = sld [smem:[#allocation17_spill]] }
 0x457   : > { %s2204_s21 = sld [smem:[#allocation12_spill]]  ;;  %s2208_s0 = smov %s1663_s20 }
 0x458   : > { %s2205_s30 = sld [smem:[#allocation13_spill]] }
 0x459   : > { %s2206_s23 = sld [smem:[#allocation14_spill]] }
 0x45a   : > { %s2207_s24 = sld [smem:[#allocation15_spill]]  ;;  %29 = sbr.rel (!%p27_p1) target bundleno = 20 (0x14), region = 106 }
 0x45b   : > { %s2209_s20 = smov %s2202_s5 }
 0x45c   : > { %s2210_s5 = smov %s2203_s22 }
 0x45e   : > { %s2211_s22 = smov %s2205_s30 }
 0x45f   :  { %1151 = vsyncpa [#allocation7], 1 }
 0x460   :  { %1153 = vsyncpa [#allocation7 + $0x1], 1 }

</bundles_post_ra>
